<compile_context>
chip_gen: v6e
topology: v6e:2x2x1
jax: 0.10.0
libtpu: 0.0.40
codegen_flags: <defaults>
</compile_context>

<pallas_src>
import jax
import jax.numpy as jnp
from jax.experimental import pallas as pl
from jax.experimental.pallas import tpu as pltpu

# ----------------------------- configuration -------------------------------
NUM_NODES = 16      # num_nodes
IN_DIM    = 8       # in_dim (per-node feature dim of x_src / x_dst)
HIDDEN    = 32      # encoder hidden width
OUT_DIM   = 16      # out_dim (node embedding dim)
DEC_HID   = 32      # decoder hidden width
NUM_DEC   = 2       # number of decoders
NUM_EDGES = 32      # edges in the batch


# ------------------------------ fused Pallas kernel ------------------------
def _orthrus_kernel(xs_ref, xd_ref, ei_ref,
                    w1s_ref, w1d_ref, b1_ref, w2_ref, b2_ref,
                    wsc_ref, wdc_ref, bc_ref, vc_ref,
                    scores_ref, loss_ref, h_ref, mask_ref):
    # ---- encoder: 2-layer MLP; concat(x_src, x_dst)@W1 expressed as 2 matmuls
    z1 = (jnp.dot(xs_ref[...], w1s_ref[...], preferred_element_type=jnp.float32)
          + jnp.dot(xd_ref[...], w1d_ref[...], preferred_element_type=jnp.float32)
          + b1_ref[...])
    z1 = jnp.maximum(z1, 0.0)
    h = jnp.dot(z1, w2_ref[...], preferred_element_type=jnp.float32) + b2_ref[...]
    h_ref[...] = h                                            # [N, OUT_DIM]

    # ---- edge gather h[src], h[dst] as one-hot matmuls on the MXU
    ei = ei_ref[...]                                          # [E, 2] int32
    e = ei.shape[0]
    n = h.shape[0]
    node_iota = jax.lax.broadcasted_iota(jnp.int32, (e, n), 1)
    oh_src = (node_iota == ei[:, 0:1]).astype(jnp.float32)    # [E, N]
    oh_dst = (node_iota == ei[:, 1:2]).astype(jnp.float32)    # [E, N]
    hs = jnp.dot(oh_src, h, preferred_element_type=jnp.float32)   # [E, OUT_DIM]
    hd = jnp.dot(oh_dst, h, preferred_element_type=jnp.float32)   # [E, OUT_DIM]

    # involved-node counts (1, N): > 0 outside <=> node appears in edge_index
    mask_ref[...] = jnp.sum(oh_src + oh_dst, axis=0, keepdims=True)

    # ---- all decoders fused: one wide matmul pair + relu + one contraction
    z = (jnp.dot(hs, wsc_ref[...], preferred_element_type=jnp.float32)
         + jnp.dot(hd, wdc_ref[...], preferred_element_type=jnp.float32)
         + bc_ref[...])
    z = jnp.maximum(z, 0.0)                                   # [E, NUM_DEC*DEC_HID]
    # summed per-edge scores, lane-dense row:
    #   scores[0, e] = sum_h vc[0, h] * z[e, h]  ==  sum_d (z_d @ v_d)[e]
    scores = jax.lax.dot_general(vc_ref[...], z, (((1,), (1,)), ((), ())),
                                 preferred_element_type=jnp.float32)   # [1, E]
    scores_ref[...] = scores
    # training loss = mean over edges of the summed scores
    loss_ref[...] = jnp.sum(scores, axis=1, keepdims=True) * (1.0 / e)


def _orthrus_call(packed, x_src, x_dst, edge_index_t):
    n = x_src.shape[0]
    e = edge_index_t.shape[0]
    vmem = pltpu.MemorySpace.VMEM
    out_shape = (
        jax.ShapeDtypeStruct((1, e), jnp.float32),         # summed per-edge scores
        jax.ShapeDtypeStruct((1, 1), jnp.float32),         # training loss (mean)
        jax.ShapeDtypeStruct((n, OUT_DIM), jnp.float32),   # node embeddings h
        jax.ShapeDtypeStruct((1, n), jnp.float32),         # involved-node counts
    )
    return pl.pallas_call(
        _orthrus_kernel,
        out_shape=out_shape,
        # single block, no grid: every operand/result is a full array in VMEM
        in_specs=[pl.BlockSpec(memory_space=vmem)] * 12,
        out_specs=tuple(pl.BlockSpec(memory_space=vmem) for _ in range(4)),
    )(x_src, x_dst, edge_index_t,
      packed["w1s"], packed["w1d"], packed["b1"],
      packed["w2"], packed["b2"],
      packed["wsc"], packed["wdc"], packed["bc"], packed["vc"])


# ------------------------------- Orthrus forward ----------------------------
def orthrus_forward(packed, state, x_src, x_dst, edge_index, *,
                    inference=False, use_contrastive_learning=True):
    """Mirrors Orthrus.forward. Returns (loss_or_scores, new_state). jit-able."""
    ei_t = edge_index.T.astype(jnp.int32)                    # [E, 2] (src, dst)
    scores_row, loss_row, h, involved_cnt = _orthrus_call(packed, x_src, x_dst, ei_t)
    scores = scores_row[0]                                    # [E]

    last_h_storage, last_h_non_empty = state
    if use_contrastive_learning:
        involved = involved_cnt[0] > 0.0                      # bool [N]
        # == last_h_storage[edge_index.flatten()] = cat(h_src, h_dst).detach()
        last_h_storage = jnp.where(involved[:, None], h, last_h_storage)
        # static-shape presence mask instead of torch's growing .unique() list
        last_h_non_empty = jnp.logical_or(last_h_non_empty, involved)
    new_state = (last_h_storage, last_h_non_empty)

    # inference -> per-edge scores (E,); training -> summed decoder loss (1,)
    loss_or_scores = scores if inference else loss_row[0]
    return loss_or_scores, new_state


# --------------------------------- reference --------------------------------
def _reference(raw, x_src, x_dst, edge_index):
    node_feat = jnp.concatenate([x_src, x_dst], axis=-1)
    z = jnp.maximum(node_feat @ raw["w1"] + raw["b1"], 0.0)
    h = z @ raw["w2"] + raw["b2"]
    hs, hd = h[edge_index[0]], h[edge_index[1]]
    scores = jnp.zeros((edge_index.shape[1],), jnp.float32)
    for d in range(NUM_DEC):
        zd = jnp.maximum(hs @ raw["ws"][d] + hd @ raw["wd"][d] + raw["b"][d], 0.0)
        scores = scores + (zd @ raw["v"][d])[:, 0]
    return scores, h


# ----------------------------------- main ------------------------------------
if __name__ == "__main__":
    key = jax.random.PRNGKey(0)
    ks = jax.random.split(key, 12)

    # "module" parameters in their natural per-decoder form
    raw = {
        "w1": jax.random.normal(ks[0], (2 * IN_DIM, HIDDEN), jnp.float32) * 0.1,
        "b1": jax.random.normal(ks[1], (1, HIDDEN), jnp.float32) * 0.1,
        "w2": jax.random.normal(ks[2], (HIDDEN, OUT_DIM), jnp.float32) * 0.1,
        "b2": jax.random.normal(ks[3], (1, OUT_DIM), jnp.float32) * 0.1,
        "ws": jax.random.normal(ks[4], (NUM_DEC, OUT_DIM, DEC_HID), jnp.float32) * 0.1,
        "wd": jax.random.normal(ks[5], (NUM_DEC, OUT_DIM, DEC_HID), jnp.float32) * 0.1,
        "b":  jax.random.normal(ks[6], (NUM_DEC, 1, DEC_HID), jnp.float32) * 0.1,
        "v":  jax.random.normal(ks[7], (NUM_DEC, DEC_HID, 1), jnp.float32) * 0.1,
    }

    # pack once at init: split w1 by source, merge all decoders into wide mats
    packed = {
        "w1s": raw["w1"][:IN_DIM],                    # [IN_DIM, HIDDEN]
        "w1d": raw["w1"][IN_DIM:],                    # [IN_DIM, HIDDEN]
        "b1":  raw["b1"], "w2": raw["w2"], "b2": raw["b2"],
        "wsc": jnp.concatenate([raw["ws"][d] for d in range(NUM_DEC)], axis=1),
        "wdc": jnp.concatenate([raw["wd"][d] for d in range(NUM_DEC)], axis=1),
        "bc":  jnp.concatenate([raw["b"][d] for d in range(NUM_DEC)], axis=1),
        "vc":  jnp.concatenate([raw["v"][d].T for d in range(NUM_DEC)], axis=1),
    }

    # inputs: node-level features + a batch of edges
    x_src = jax.random.normal(ks[8], (NUM_NODES, IN_DIM), jnp.float32)
    x_dst = jax.random.normal(ks[9], (NUM_NODES, IN_DIM), jnp.float32)
    edge_index = jax.random.randint(ks[10], (2, NUM_EDGES), 0, NUM_NODES, jnp.int32)

    # contrastive-learning state: storage + boolean presence mask (static shapes)
    state = (jnp.zeros((NUM_NODES, OUT_DIM), jnp.float32),
             jnp.zeros((NUM_NODES,), jnp.bool_))

    fwd = jax.jit(orthrus_forward,
                  static_argnames=("inference", "use_contrastive_learning"))

    # inference path -> per-edge scores, shape (E,)
    scores, state = fwd(packed, state, x_src, x_dst, edge_index,
                        inference=True, use_contrastive_learning=True)
    scores = jax.block_until_ready(scores)
    assert scores.shape == (NUM_EDGES,) and scores.dtype == jnp.float32

    # training path -> scalar loss, shape (1,)
    loss, state = fwd(packed, state, x_src, x_dst, edge_index,
                      inference=False, use_contrastive_learning=True)
    loss = jax.block_until_ready(loss)
    assert loss.shape == (1,) and loss.dtype == jnp.float32

    # correctness vs. plain-JAX reference
    ref_scores, ref_h = _reference(raw, x_src, x_dst, edge_index)
    ref_loss = jnp.mean(ref_scores, keepdims=True)
    assert jnp.allclose(scores, ref_scores, atol=1e-4, rtol=1e-4)
    assert jnp.allclose(loss, ref_loss, atol=1e-4, rtol=1e-4)

    # contrastive-state semantics: involved rows hold h, others untouched (0)
    involved_ref = jnp.zeros((NUM_NODES,), jnp.bool_).at[edge_index.reshape(-1)].set(True)
    ref_storage = jnp.where(involved_ref[:, None], ref_h, 0.0)
    assert jnp.allclose(state[0], ref_storage, atol=1e-4, rtol=1e-4)
    assert jnp.array_equal(state[1], involved_ref)

    print("KERNEL_OK")
</pallas_src>

<mosaic_0001>
module attributes {stable_mosaic.version = 11 : i64} {
  func.func @_orthrus_kernel(%arg0: memref<16x8xf32, #tpu.memory_space<vmem>>, %arg1: memref<16x8xf32, #tpu.memory_space<vmem>>, %arg2: memref<32x2xi32, #tpu.memory_space<vmem>>, %arg3: memref<8x32xf32, #tpu.memory_space<vmem>>, %arg4: memref<8x32xf32, #tpu.memory_space<vmem>>, %arg5: memref<1x32xf32, #tpu.memory_space<vmem>>, %arg6: memref<32x16xf32, #tpu.memory_space<vmem>>, %arg7: memref<1x16xf32, #tpu.memory_space<vmem>>, %arg8: memref<16x64xf32, #tpu.memory_space<vmem>>, %arg9: memref<16x64xf32, #tpu.memory_space<vmem>>, %arg10: memref<1x64xf32, #tpu.memory_space<vmem>>, %arg11: memref<1x64xf32, #tpu.memory_space<vmem>>, %arg12: memref<1x32xf32, #tpu.memory_space<vmem>>, %arg13: memref<1x1xf32, #tpu.memory_space<vmem>>, %arg14: memref<16x16xf32, #tpu.memory_space<vmem>>, %arg15: memref<1x16xf32, #tpu.memory_space<vmem>>) attributes {dimension_semantics = [], scalar_prefetch = 0 : i64, scratch_operands = 0 : i64, tpu.core_type = #tpu.core_type<tc>} {
    %c0 = arith.constant 0 : index
    %c0_0 = arith.constant 0 : index
    %0 = vector.load %arg0[%c0, %c0_0] : memref<16x8xf32, #tpu.memory_space<vmem>>, vector<16x8xf32>
    %c0_1 = arith.constant 0 : index
    %c0_2 = arith.constant 0 : index
    %1 = vector.load %arg3[%c0_1, %c0_2] : memref<8x32xf32, #tpu.memory_space<vmem>>, vector<8x32xf32>
    %cst = arith.constant dense<0.000000e+00> : vector<16x32xf32>
    %2 = tpu.matmul %0, %1, %cst {dimension_numbers = #tpu.dot_dimension_numbers<[1], [0], [0], [1], [0, 0, 1, 1], [], []>} : vector<16x8xf32>, vector<8x32xf32>, vector<16x32xf32> -> vector<16x32xf32>
    %c0_3 = arith.constant 0 : index
    %c0_4 = arith.constant 0 : index
    %3 = vector.load %arg1[%c0_3, %c0_4] : memref<16x8xf32, #tpu.memory_space<vmem>>, vector<16x8xf32>
    %c0_5 = arith.constant 0 : index
    %c0_6 = arith.constant 0 : index
    %4 = vector.load %arg4[%c0_5, %c0_6] : memref<8x32xf32, #tpu.memory_space<vmem>>, vector<8x32xf32>
    %cst_7 = arith.constant dense<0.000000e+00> : vector<16x32xf32>
    %5 = tpu.matmul %3, %4, %cst_7 {dimension_numbers = #tpu.dot_dimension_numbers<[1], [0], [0], [1], [0, 0, 1, 1], [], []>} : vector<16x8xf32>, vector<8x32xf32>, vector<16x32xf32> -> vector<16x32xf32>
    %6 = arith.addf %2, %5 : vector<16x32xf32>
    %c0_8 = arith.constant 0 : index
    %c0_9 = arith.constant 0 : index
    %7 = vector.load %arg5[%c0_8, %c0_9] : memref<1x32xf32, #tpu.memory_space<vmem>>, vector<1x32xf32>
    %8 = vector.broadcast %7 : vector<1x32xf32> to vector<16x32xf32>
    %9 = arith.addf %6, %8 : vector<16x32xf32>
    %cst_10 = arith.constant 0.000000e+00 : f32
    %10 = vector.broadcast %cst_10 : f32 to vector<16x32xf32>
    %11 = arith.maximumf %9, %10 : vector<16x32xf32>
    %c0_11 = arith.constant 0 : index
    %c0_12 = arith.constant 0 : index
    %12 = vector.load %arg6[%c0_11, %c0_12] : memref<32x16xf32, #tpu.memory_space<vmem>>, vector<32x16xf32>
    %cst_13 = arith.constant dense<0.000000e+00> : vector<16x16xf32>
    %13 = tpu.matmul %11, %12, %cst_13 {dimension_numbers = #tpu.dot_dimension_numbers<[1], [0], [0], [1], [0, 0, 1, 1], [], []>} : vector<16x32xf32>, vector<32x16xf32>, vector<16x16xf32> -> vector<16x16xf32>
    %c0_14 = arith.constant 0 : index
    %c0_15 = arith.constant 0 : index
    %14 = vector.load %arg7[%c0_14, %c0_15] : memref<1x16xf32, #tpu.memory_space<vmem>>, vector<1x16xf32>
    %15 = vector.broadcast %14 : vector<1x16xf32> to vector<16x16xf32>
    %16 = arith.addf %13, %15 : vector<16x16xf32>
    %c0_16 = arith.constant 0 : index
    %c0_17 = arith.constant 0 : index
    %17 = vector.load %arg14[%c0_16, %c0_17] : memref<16x16xf32, #tpu.memory_space<vmem>>, vector<16x16xf32>
    tpu.vector_store %arg14[%c0_16, %c0_17], %16 {strides = array<i32>} : memref<16x16xf32, #tpu.memory_space<vmem>>, vector<16x16xf32>,
    %c0_18 = arith.constant 0 : index
    %c0_19 = arith.constant 0 : index
    %18 = vector.load %arg2[%c0_18, %c0_19] : memref<32x2xi32, #tpu.memory_space<vmem>>, vector<32x2xi32>
    %19 = tpu.iota {dimensions = array<i32: 1>} : vector<32x16xi32>
    %20 = vector.extract_strided_slice %18 {offsets = [0, 0], sizes = [32, 1], strides = [1, 1]} : vector<32x2xi32> to vector<32x1xi32>
    %21 = vector.broadcast %20 : vector<32x1xi32> to vector<32x16xi32>
    %22 = arith.cmpi eq, %19, %21 : vector<32x16xi32>
    %23 = arith.extui %22 : vector<32x16xi1> to vector<32x16xi32>
    %24 = arith.sitofp %23 : vector<32x16xi32> to vector<32x16xf32>
    %25 = vector.extract_strided_slice %18 {offsets = [0, 1], sizes = [32, 1], strides = [1, 1]} : vector<32x2xi32> to vector<32x1xi32>
    %26 = vector.broadcast %25 : vector<32x1xi32> to vector<32x16xi32>
    %27 = arith.cmpi eq, %19, %26 : vector<32x16xi32>
    %28 = arith.extui %27 : vector<32x16xi1> to vector<32x16xi32>
    %29 = arith.sitofp %28 : vector<32x16xi32> to vector<32x16xf32>
    %cst_20 = arith.constant dense<0.000000e+00> : vector<32x16xf32>
    %30 = tpu.matmul %24, %16, %cst_20 {dimension_numbers = #tpu.dot_dimension_numbers<[1], [0], [0], [1], [0, 0, 1, 1], [], []>} : vector<32x16xf32>, vector<16x16xf32>, vector<32x16xf32> -> vector<32x16xf32>
    %cst_21 = arith.constant dense<0.000000e+00> : vector<32x16xf32>
    %31 = tpu.matmul %29, %16, %cst_21 {dimension_numbers = #tpu.dot_dimension_numbers<[1], [0], [0], [1], [0, 0, 1, 1], [], []>} : vector<32x16xf32>, vector<16x16xf32>, vector<32x16xf32> -> vector<32x16xf32>
    %32 = arith.addf %24, %29 : vector<32x16xf32>
    %cst_22 = arith.constant dense<0.000000e+00> : vector<16xf32>
    %33 = vector.multi_reduction <add>, %32, %cst_22 [0] : vector<32x16xf32> to vector<16xf32>
    %34 = vector.shape_cast %33 : vector<16xf32> to vector<1x16xf32>
    %c0_23 = arith.constant 0 : index
    %c0_24 = arith.constant 0 : index
    %35 = vector.load %arg15[%c0_23, %c0_24] : memref<1x16xf32, #tpu.memory_space<vmem>>, vector<1x16xf32>
    tpu.vector_store %arg15[%c0_23, %c0_24], %34 {strides = array<i32>} : memref<1x16xf32, #tpu.memory_space<vmem>>, vector<1x16xf32>,
    %c0_25 = arith.constant 0 : index
    %c0_26 = arith.constant 0 : index
    %36 = vector.load %arg8[%c0_25, %c0_26] : memref<16x64xf32, #tpu.memory_space<vmem>>, vector<16x64xf32>
    %cst_27 = arith.constant dense<0.000000e+00> : vector<32x64xf32>
    %37 = tpu.matmul %30, %36, %cst_27 {dimension_numbers = #tpu.dot_dimension_numbers<[1], [0], [0], [1], [0, 0, 1, 1], [], []>} : vector<32x16xf32>, vector<16x64xf32>, vector<32x64xf32> -> vector<32x64xf32>
    %c0_28 = arith.constant 0 : index
    %c0_29 = arith.constant 0 : index
    %38 = vector.load %arg9[%c0_28, %c0_29] : memref<16x64xf32, #tpu.memory_space<vmem>>, vector<16x64xf32>
    %cst_30 = arith.constant dense<0.000000e+00> : vector<32x64xf32>
    %39 = tpu.matmul %31, %38, %cst_30 {dimension_numbers = #tpu.dot_dimension_numbers<[1], [0], [0], [1], [0, 0, 1, 1], [], []>} : vector<32x16xf32>, vector<16x64xf32>, vector<32x64xf32> -> vector<32x64xf32>
    %40 = arith.addf %37, %39 : vector<32x64xf32>
    %c0_31 = arith.constant 0 : index
    %c0_32 = arith.constant 0 : index
    %41 = vector.load %arg10[%c0_31, %c0_32] : memref<1x64xf32, #tpu.memory_space<vmem>>, vector<1x64xf32>
    %42 = vector.broadcast %41 : vector<1x64xf32> to vector<32x64xf32>
    %43 = arith.addf %40, %42 : vector<32x64xf32>
    %cst_33 = arith.constant 0.000000e+00 : f32
    %44 = vector.broadcast %cst_33 : f32 to vector<32x64xf32>
    %45 = arith.maximumf %43, %44 : vector<32x64xf32>
    %c0_34 = arith.constant 0 : index
    %c0_35 = arith.constant 0 : index
    %46 = vector.load %arg11[%c0_34, %c0_35] : memref<1x64xf32, #tpu.memory_space<vmem>>, vector<1x64xf32>
    %cst_36 = arith.constant dense<0.000000e+00> : vector<1x32xf32>
    %47 = tpu.matmul %46, %45, %cst_36 {dimension_numbers = #tpu.dot_dimension_numbers<[1], [1], [0], [0], [0, 0, 1, 0], [], []>} : vector<1x64xf32>, vector<32x64xf32>, vector<1x32xf32> -> vector<1x32xf32>
    %c0_37 = arith.constant 0 : index
    %c0_38 = arith.constant 0 : index
    %48 = vector.load %arg12[%c0_37, %c0_38] : memref<1x32xf32, #tpu.memory_space<vmem>>, vector<1x32xf32>
    tpu.vector_store %arg12[%c0_37, %c0_38], %47 {strides = array<i32>} : memref<1x32xf32, #tpu.memory_space<vmem>>, vector<1x32xf32>,
    %cst_39 = arith.constant dense<0.000000e+00> : vector<1xf32>
    %49 = vector.multi_reduction <add>, %47, %cst_39 [1] : vector<1x32xf32> to vector<1xf32>
    %50 = vector.shape_cast %49 : vector<1xf32> to vector<1x1xf32>
    %cst_40 = arith.constant 3.125000e-02 : f32
    %51 = vector.broadcast %cst_40 : f32 to vector<1x1xf32>
    %52 = arith.mulf %50, %51 : vector<1x1xf32>
    %c0_41 = arith.constant 0 : index
    %c0_42 = arith.constant 0 : index
    %53 = vector.load %arg13[%c0_41, %c0_42] : memref<1x1xf32, #tpu.memory_space<vmem>>, vector<1x1xf32>
    tpu.vector_store %arg13[%c0_41, %c0_42], %52 {strides = array<i32>} : memref<1x1xf32, #tpu.memory_space<vmem>>, vector<1x1xf32>,
    return
  }
}

</mosaic_0001>

<bundles_post_ra>
// kernel: orthrus_forward.1
= control target key start
LH: loop header
LB: loop body
LE: loop exit
PB: predicated region body
PF: predicated region fallthrough
CT: control target
= control target key end

     0   :  { %21 = vsyncpa [#allocation3], 0  ;;  %vm53_vm0 = vcmask 64512   ;;  %s1347_s0 = inlined_call_operand.vmem [shape: f32[16,8], index: 0, kind: input, shape index: {}]   ;;  %s1348_s1 = inlined_call_operand.vmem [shape: f32[16,8], index: 1, kind: input, shape index: {}]   ;;  %s1349_s2 = inlined_call_operand.vmem [shape: s32[32,2], index: 2, kind: input, shape index: {}]   ;;  %s1350_s3 = inlined_call_operand.vmem [shape: f32[8,32], index: 3, kind: input, shape index: {}]   ;;  %s1351_s4 = inlined_call_operand.vmem [shape: f32[8,32], index: 4, kind: input, shape index: {}]   ;;  %s1352_s5 = inlined_call_operand.vmem [shape: f32[1,32], index: 5, kind: input, shape index: {}]   ;;  %s1353_s6 = inlined_call_operand.vmem [shape: f32[32,16], index: 6, kind: input, shape index: {}]   ;;  %s1354_s7 = inlined_call_operand.vmem [shape: f32[1,16], index: 7, kind: input, shape index: {}]   ;;  %s1355_s8 = inlined_call_operand.vmem [shape: f32[16,64], index: 8, kind: input, shape index: {}]   ;;  %s1356_s9 = inlined_call_operand.vmem [shape: f32[16,64], index: 9, kind: input, shape index: {}]   ;;  %s1357_s10 = inlined_call_operand.vmem [shape: f32[1,64], index: 10, kind: input, shape index: {}]   ;;  %s1358_s11 = inlined_call_operand.vmem [shape: f32[1,64], index: 11, kind: input, shape index: {}]   ;;  %s1359_s12 = inlined_call_operand.hbm [shape: f32[1,32], index: 12, kind: output, shape index: {0}]   ;;  %s1360_s13 = inlined_call_operand.hbm [shape: f32[1,1], index: 13, kind: output, shape index: {1}]   ;;  %s1361_s14 = inlined_call_operand.vmem [shape: f32[16,16], index: 14, kind: output, shape index: {2}]   ;;  %s1362_s15 = inlined_call_operand.vmem [shape: f32[1,16], index: 15, kind: output, shape index: {3}]  }
   0x1   :  { %v52_v0 = vld [vmem:[%s1351_s4] sm:$0xff]  ;;  %v51_v4 = vld [vmem:[%s1348_s1 + $0x8] sm:$0xff] }
   0x2   :  { %v49_v1 = vld [vmem:[%s1350_s3] sm:$0xff]  ;;  %1013 = vmatprep.subr.mxu0 %v52_v0  ;;  %v48_v5 = vld [vmem:[%s1347_s0 + $0x8] sm:$0xff] }
   0x3   :  { %v50_v2 = vld [vmem:[%s1348_s1] sm:$0xff]  ;;  %1018 = vmatprep.subr.mxu1 %v49_v1  ;;  %1014 = vmatpush3.msra.mxu0 %v52_v0 }
   0x4   :  { %v47_v3 = vld [vmem:[%s1347_s0] sm:$0xff]  ;;  %1015 = vmatprep.mubr.msk.f32.mxu0 %vm53_vm0, %v50_v2 }
   0x5   :  { %22 = vsyncpa [#allocation5], 0  ;;  %1019 = vmatpush3.msra.mxu1 %v49_v1  ;;  %1020 = vmatprep.mubr.msk.f32.mxu1 %vm53_vm0, %v47_v3  ;;  %v230_v6 = vld [vmem:[%s1353_s6 + $0x18] sm:$0xff]  ;;  %v229_v7 = vld [vmem:[%s1353_s6 + $0x10] sm:$0xff]  ;;  %v1140_v12 = vmov 0   ;;  %v1141_v13 = vmov 1   ;;  %v327_v18 = vlaneseq }
   0x6   :  { %1016 = vmatmul.mubr.msk.f32.vlgmr.msra.gmra.mxu0 %vm53_vm0, %v51_v4  ;;  %1021 = vmatmul.mubr.msk.f32.vlgmr.msra.gmra.mxu1 %vm53_vm0, %v48_v5  ;;  %v228_v8 = vld [vmem:[%s1353_s6 + $0x8] sm:$0xff]  ;;  %v227_v9 = vld [vmem:[%s1353_s6] sm:$0xff]  ;;  %v325_v14 = vld [vmem:[%s1349_s2 + $0x10] sm:$0xff]  ;;  %vm238_vm1 = vcmask 261120   ;;  %v1142_v31 = vmov 0.0   ;;  %vm320_vm4 = vcmask 130048  }
   0x7   :  { %1023 = vmatprep.subr.mxu0 %v230_v6  ;;  %v324_v10 = vld [vmem:[%s1349_s2 + $0x8] sm:$0xff]  ;;  %v323_v11 = vld [vmem:[%s1349_s2] sm:$0xff]  ;;  %1093 = vset.pattern.permute.xlu1 %v1140_v12  ;;  %v326_v15 = vld [vmem:[%s1349_s2 + $0x18] sm:$0xff]  ;;  %v328_v25 = vand.u32 127, %v327_v18  ;;  %vm588_vm11 = vcmask 122880   ;;  %vm1143_vm12 = vmmov 0  }
   0x8   :  { %1024 = vmatpush3.msra.mxu0 %v230_v6  ;;  %1091 = vset.pattern.permute.xlu0 %v1140_v12  ;;  %v938_v20 = vld [vmem:[%s1352_s5] ss:$0 sm:$0xff]  ;;  %v593_v4 = vld [vmem:[%s1356_s9 + $0x8] sm:$0xff]  ;;  %vm804_vm13 = vcmask 523264   ;;  %vm890_vm14 = vcmask 253952   ;;  %s1144_s21 = smov [#allocation2]  }
   0x9   :  { %1025 = vmatprep.subr.mxu0 %v229_v7  ;;  %333 = vperm.xlu1 %1093, %v324_v10   ;;  %v939_v63 = vld [vmem:[%s1354_s7] ss:$0 sm:$0xff]  ;;  %v591_v5 = vld [vmem:[%s1355_s8 + $0x8] sm:$0xff]  ;;  %s904_s22 = sshll.u32 %s1144_s21, 4  ;;  %s905_s22 = int_to_ptr.vmem [resolvable:$true] %s904_s22 }
   0xa   :  { %1026 = vmatpush3.msra.mxu0 %v229_v7  ;;  %330 = vperm.xlu0 %1091, %v323_v11   ;;  %v592_v6 = vld [vmem:[%s1356_s9] sm:$0xff]  ;;  %s1096_s6 = scalar_lea.vmem %s905_s22, 16  ;;  %s1100_s23 = scalar_lea.vmem %s905_s22, 32 }
   0xb   :  { %1027 = vmatprep.subr.mxu0 %v228_v8  ;;  %v590_v7 = vld [vmem:[%s1355_s8] sm:$0xff]  ;;  %p1097_p0 = scmp.ne.s32.totalorder %s905_s22, %s1096_s6  ;;  %p1101_p1 = scmp.lt.s32.totalorder %s905_s22, %s905_s22 }
   0xc   :  { %1028 = vmatpush3.msra.mxu0 %v228_v8  ;;  %p1102_p2 = scmp.lt.s32.totalorder %s1100_s23, %s1096_s6 }
   0xd   :  { %1029 = vmatprep.subr.mxu0 %v227_v9  ;;  %1094 = vset.pattern.permute.xlu1 %v1141_v13 }
   0xe   :  { %1030 = vmatpush3.msra.mxu0 %v227_v9  ;;  %1092 = vset.pattern.permute.xlu0 %v1141_v13  ;;  %p1103_p3 = por %p1102_p2, %p1101_p1 }
   0xf   :  { %357 = vperm.xlu1 %1094, %v324_v10   ;;  %354 = vperm.xlu0 %1092, %v323_v11  }
  0x10   :  { %p1104_p4 = pnand %p1103_p3, %p1097_p0 }
  0x13   :  { %1095 = vset.pattern.permute.xlu1 %v1140_v12  ;;  %360 = vperm.xlu0 %1092, %v325_v14  }
  0x14   :  { %336 = vperm.xlu1 %1095, %v325_v14  }
  0x17   :  { %363 = vperm.xlu0 %1092, %v326_v15  }
  0x18   :  { %339 = vperm.xlu1 %1095, %v326_v15  }
  0x84   :  { %v334_v28 = vpop.permute.xlu1 %333 }
  0x85   :  { %v331_v29 = vpop.permute.xlu0 %330  ;;  %vm342_vm3 = vcmp.eq.s32.totalorder %v328_v25, %v334_v28 }
  0x86   :  { %vm341_vm2 = vcmp.eq.s32.totalorder %v328_v25, %v331_v29  ;;  %v943_v33 = vsel %vm342_vm3, 1.0, %v1142_v31 }
  0x87   :  { %v942_v32 = vsel %vm341_vm2, 1.0, %v1142_v31 }
  0x88   :  { %1038 = vmatprep.mubr.msk.f32.mxu1 %vm320_vm4, %v942_v32 }
  0x8a   :  { %v358_v34 = vpop.permute.xlu1 %357  ;;  %v355_v35 = vpop.permute.xlu0 %354 }
  0x8b   :  { %vm366_vm5 = vcmp.eq.s32.totalorder %v328_v25, %v358_v34  ;;  %vm365_vm6 = vcmp.eq.s32.totalorder %v328_v25, %v355_v35 }
  0x8c   :  { %v947_v36 = vsel %vm366_vm5, 1.0, %v1142_v31  ;;  %v946_v37 = vsel %vm365_vm6, 1.0, %v1142_v31 }
  0x8d   :  { %v572_v38 = vadd.f32 %v947_v36, %v943_v33  ;;  %v571_v39 = vadd.f32 %v946_v37, %v942_v32 }
  0x8e   :  { %v361_v40 = vpop.permute.xlu0 %360 }
  0x8f   :  { %v576_v41 = vsel %vm320_vm4, %v572_v38, 0.0  ;;  %v575_v42 = vsel %vm320_vm4, %v571_v39, 0.0  ;;  %v337_v43 = vpop.permute.xlu1 %336  ;;  %vm367_vm7 = vcmp.eq.s32.totalorder %v328_v25, %v361_v40  ;;  %v803_v38 = vld [vmem:[%s1358_s11] sm:$0x1] }
  0x90   :  { %vm343_vm8 = vcmp.eq.s32.totalorder %v328_v25, %v337_v43  ;;  %v948_v44 = vsel %vm367_vm7, 1.0, %v1142_v31  ;;  %v577_v45 = vadd.f32 %v576_v41, %v575_v42 }
  0x91   :  { %v944_v46 = vsel %vm343_vm8, 1.0, %v1142_v31 }
  0x92   :  { %v573_v47 = vadd.f32 %v948_v44, %v944_v46  ;;  %v364_v48 = vpop.permute.xlu0 %363 }
  0x93   :  { %v340_v49 = vpop.permute.xlu1 %339  ;;  %vm368_vm9 = vcmp.eq.s32.totalorder %v328_v25, %v364_v48 }
  0x94   :  { %v578_v50 = vsel %vm320_vm4, %v573_v47, 0.0  ;;  %vm344_vm10 = vcmp.eq.s32.totalorder %v328_v25, %v340_v49  ;;  %v949_v51 = vsel %vm368_vm9, 1.0, %v1142_v31 }
  0x95   :  { %v579_v52 = vadd.f32 %v578_v50, %v577_v45  ;;  %v945_v53 = vsel %vm344_vm10, 1.0, %v1142_v31 }
  0x96   :  { %v574_v54 = vadd.f32 %v949_v51, %v945_v53 }
  0x98   :  { %v580_v55 = vsel %vm320_vm4, %v574_v54, 0.0 }
  0x99   :  { %v581_v56 = vadd.f32 %v580_v55, %v579_v52 }
  0x9b   :  { %v582_v57 = vrot.slane %v581_v56, 4 }
  0x9d   :  { %v583_v58 = vadd.f32 %v582_v57, %v581_v56 }
  0x9f   :  { %v584_v59 = vrot.slane %v583_v58, 2 }
  0xa1   :  { %v585_v60 = vadd.f32 %v584_v59, %v583_v58 }
  0xa3   :  { %v586_v61 = vrot.slane %v585_v60, 1 }
  0xa5   :  { %v587_v62 = vadd.f32 %v586_v61, %v585_v60 }
  0xa7   :  { %589 = vst.msk [vmem:[%s1362_s15] sm:$0x1] %vm588_vm11, %v587_v62 }
  0xc6   :  { %v1017_v16 = vpop.f32.mrf.mxu0  ;;  %v1022_v17 = vpop.f32.mrf.mxu1 }
  0xc7   :  { %v213_v19 = vadd.f32 %v1022_v17, %v1017_v16 }
  0xc8   :  { %v126_v21 = vpop.f32.mrf.mxu0  ;;  %v207_v22 = vpop.f32.mrf.mxu1 }
  0xc9   :  { %v208_v23 = vadd.f32 %v207_v22, %v126_v21  ;;  %v224_v24 = vadd.f32 %v938_v20, %v213_v19 }
  0xcb   :  { %v223_v26 = vadd.f32 %v938_v20, %v208_v23  ;;  %v226_v30 = vmax.f32 %v224_v24, 0.0  ;;  %v966_v23 = vld [vmem:[%s1357_s10] ss:$0 sm:$0xff] }
  0xcd   :  { %v225_v27 = vmax.f32 %v223_v26, 0.0 }
  0xcf   :  { %1031 = vmatprep.mubr.msk.f32.mxu0 %vm238_vm1, %v225_v27 }
  0xd0   :  { %1032 = vmatmul.mubr.msk.f32.vlgmr.msra.gmra.mxu0 %vm238_vm1, %v226_v30 }
  0xd1   :  { %1048 = vmatprep.mubr.msk.f32.mxu0 %vm320_vm4, %v946_v37 }
 0x190   :  { %v1033_v0 = vpop.f32.mrf.mxu0 }
 0x191   :  { %v317_v1 = vadd.f32 %v1033_v0, %v939_v63 }
 0x192   :  { %v311_v2 = vpop.f32.mrf.mxu0 }
 0x193   :  { %322 = vst.msk [vmem:[%s1361_s14 + $0x8] sm:$0xff] %vm320_vm4, %v317_v1  ;;  %v312_v3 = vadd.f32 %v939_v63, %v311_v2  ;;  %1034 = vmatprep.subr.mxu1 %v317_v1  ;;  %1044 = vmatprep.subr.mxu0 %v317_v1 }
 0x194   :  { %1035 = vmatpush3.msra.mxu1 %v317_v1  ;;  %1045 = vmatpush3.msra.mxu0 %v317_v1 }
 0x195   :  { %321 = vst.msk [vmem:[%s1361_s14] sm:$0xff] %vm320_vm4, %v312_v3  ;;  %1036 = vmatprep.subr.mxu1 %v312_v3  ;;  %1046 = vmatprep.subr.mxu0 %v312_v3 }
 0x196   :  { %1037 = vmatpush3.msra.mxu1 %v312_v3  ;;  %1047 = vmatpush3.msra.mxu0 %v312_v3 }
 0x197   :  { %1039 = vmatmul.mubr.msk.f32.vlgmr.msra.gmra.mxu1 %vm320_vm4, %v943_v33  ;;  %1049 = vmatmul.mubr.msk.f32.vlgmr.msra.gmra.mxu0 %vm320_vm4, %v947_v36 }
 0x198   :  { %1041 = vmatprep.mubr.msk.f32.mxu1 %vm320_vm4, %v944_v46  ;;  %1051 = vmatprep.mubr.msk.f32.mxu0 %vm320_vm4, %v948_v44 }
 0x199   :  { %1054 = vmatprep.subr.mxu1 %v593_v4  ;;  %1064 = vmatprep.subr.mxu0 %v591_v5 }
 0x19a   :  { %1055 = vmatpush3.msra.mxu1 %v593_v4  ;;  %1065 = vmatpush3.msra.mxu0 %v591_v5 }
 0x19b   :  { %1042 = vmatmul.mubr.msk.f32.gmra.mxu1 %vm320_vm4, %v945_v53  ;;  %1052 = vmatmul.mubr.msk.f32.gmra.mxu0 %vm320_vm4, %v949_v51 }
 0x19c   :  { %1056 = vmatprep.subr.mxu1 %v592_v6  ;;  %1066 = vmatprep.subr.mxu0 %v590_v7 }
 0x19d   :  { %1057 = vmatpush3.msra.mxu1 %v592_v6  ;;  %1067 = vmatpush3.msra.mxu0 %v590_v7 }
 0x19e   :  { %1074 = vmatprep.subr.mxu1 %v1142_v31 }
 0x257   :  { %v1040_v8 = vpop.f32.mrf.mxu1  ;;  %v1050_v9 = vpop.f32.mrf.mxu0 }
 0x259   :  { %v455_v10 = vpop.f32.mrf.mxu1  ;;  %v552_v11 = vpop.f32.mrf.mxu0 }
 0x25a   :  { %1058 = vmatprep.mubr.msk.f32.mxu1 %vm320_vm4, %v552_v11  ;;  %1068 = vmatprep.mubr.msk.f32.mxu0 %vm320_vm4, %v455_v10 }
 0x25b   :  { %v1043_v12 = vpop.f32.mrf.mxu1  ;;  %v1053_v13 = vpop.f32.mrf.mxu0  ;;  %1059 = vmatmul.mubr.msk.f32.vlgmr.msra.gmra.mxu1 %vm320_vm4, %v1050_v9  ;;  %1069 = vmatmul.mubr.msk.f32.vlgmr.msra.gmra.mxu0 %vm320_vm4, %v1040_v8 }
 0x25d   :  { %v465_v14 = vpop.f32.mrf.mxu1  ;;  %v562_v15 = vpop.f32.mrf.mxu0 }
 0x25e   :  { %1061 = vmatprep.mubr.msk.f32.mxu1 %vm320_vm4, %v562_v15  ;;  %1071 = vmatprep.mubr.msk.f32.mxu0 %vm320_vm4, %v465_v14 }
 0x25f   :  { %1062 = vmatmul.mubr.msk.f32.gmra.mxu1 %vm320_vm4, %v1053_v13  ;;  %1072 = vmatmul.mubr.msk.f32.gmra.mxu0 %vm320_vm4, %v1043_v12 }
 0x260   :  { %1082 = vmatprep.mubr.msk.f32.mxu1 %vm1143_vm12, %v1142_v31 }
 0x31b   :  { %v1060_v16 = vpop.f32.mrf.mxu1  ;;  %v1070_v17 = vpop.f32.mrf.mxu0 }
 0x31c   :  { %v775_v28 = vadd.f32 %v1070_v17, %v1060_v16 }
 0x31d   :  { %v672_v18 = vpop.f32.mrf.mxu1  ;;  %v769_v19 = vpop.f32.mrf.mxu0 }
 0x31e   :  { %v796_v32 = vadd.f32 %v966_v23, %v775_v28  ;;  %v770_v33 = vadd.f32 %v769_v19, %v672_v18 }
 0x31f   :  { %v1063_v20 = vpop.f32.mrf.mxu1  ;;  %v1073_v21 = vpop.f32.mrf.mxu0 }
 0x320   :  { %v785_v22 = vadd.f32 %v1073_v21, %v1063_v20  ;;  %v800_v35 = vmax.f32 %v796_v32, 0.0  ;;  %v795_v36 = vadd.f32 %v966_v23, %v770_v33 }
 0x321   :  { %v682_v24 = vpop.f32.mrf.mxu1  ;;  %v779_v25 = vpop.f32.mrf.mxu0 }
 0x322   :  { %v798_v26 = vadd.f32 %v966_v23, %v785_v22  ;;  %v780_v27 = vadd.f32 %v779_v25, %v682_v24  ;;  %v799_v37 = vmax.f32 %v795_v36, 0.0 }
 0x324   :  { %v802_v29 = vmax.f32 %v798_v26, 0.0  ;;  %v797_v30 = vadd.f32 %v966_v23, %v780_v27 }
 0x326   :  { %1075 = vmatpush3.xpose.msk.msra.mxu1 %vm804_vm13, %v802_v29  ;;  %v801_v34 = vmax.f32 %v797_v30, 0.0 }
 0x327   :  { %1076 = vmatprep.subr.mxu1 %v1142_v31 }
 0x32a   :  { %1077 = vmatpush3.xpose.msk.msra.mxu1 %vm804_vm13, %v801_v34 }
 0x32b   :  { %1078 = vmatprep.subr.mxu1 %v1142_v31 }
 0x32e   :  { %1079 = vmatpush3.xpose.msk.msra.mxu1 %vm804_vm13, %v800_v35 }
 0x32f   :  { %1080 = vmatprep.subr.mxu1 %v1142_v31 }
 0x332   :  { %1081 = vmatpush3.xpose.msk.msra.mxu1 %vm804_vm13, %v799_v37 }
 0x335   :  { %1083 = vmatmul.mubr.msk.f32.vlgmr.msra.gmra.mxu1 %vm804_vm13, %v803_v38 }
 0x3f5   :  { %v886_v39 = vpop.f32.mrf.mxu1 }
 0x3f6   :  { %v892_v40 = vsel %vm890_vm14, %v886_v39, 0.0  ;;  %891 = vst.msk [vmem:[#allocation2] sm:$0x1] %vm890_vm14, %v886_v39 }
 0x3f7   :  { %v1084_v41 = vpop.f32.mrf.mxu1  ;;  %893 = vadd.xlane.f32.xlu1 %v892_v40 }
 0x3f8   :  { %1107 = shalt.err (!%p1104_p4)
}
 0x3f9   :  { %907 = dma.vmem_to_hbm [thread:$0]  %s905_s22, 16, %s1359_s12, [#allocation3]   ;;  %vm896_vm15 = vcmask 0  }
 0x3fa   :  { %s1145_s25 = smov [#allocation4]  }
 0x3fb   :  { %s914_s26 = sshll.u32 %s1145_s25, 4  ;;  %s915_s26 = int_to_ptr.vmem [resolvable:$true] %s914_s26 }
 0x3fc   :  { %s1116_s27 = scalar_lea.vmem %s915_s26, 16  ;;  %s1120_s2 = scalar_lea.vmem %s915_s26, 32 }
 0x3fd   :  { %p1117_p5 = scmp.ne.s32.totalorder %s915_s26, %s1116_s27  ;;  %p1121_p6 = scmp.lt.s32.totalorder %s915_s26, %s915_s26 }
 0x3fe   :  { %p1122_p7 = scmp.lt.s32.totalorder %s1120_s2, %s1116_s27 }
 0x400   :  { %p1123_p8 = por %p1122_p7, %p1121_p6 }
 0x402   :  { %p1124_p9 = pnand %p1123_p8, %p1117_p5 }
 0x480   :  { %v894_v31 = vpop.xlane.xlu1 %893 }
 0x481   :  { %v895_v42 = vmul.f32 0.03125, %v894_v31 }
 0x483   :  { %897 = vst.msk [vmem:[#allocation4] sm:$0x1] %vm896_vm15, %v895_v42 }
 0x484   :  { %1127 = shalt.err (!%p1124_p9)
}
 0x485   :  { %917 = dma.vmem_to_hbm [thread:$0]  %s915_s26, 16, %s1360_s13, [#allocation5]  }
 0x486   :  { %1136 = dma.done.wait [#allocation3], 16  }
 0x487   :  { %1137 = vsyncadd [#allocation3], 4294967280 }
 0x488   :  { %1138 = dma.done.wait [#allocation5], 16  }
 0x489   :  { %1139 = vsyncadd [#allocation5], 4294967280 }
 0x48a   :  { %932 = vsyncpa [#allocation3], 1 }
 0x48b   :  { %933 = vsyncpa [#allocation5], 1 }

</bundles_post_ra>
